<compile_context>
chip_gen: v5e
topology: v5e:2x2
jax: 0.10.0
libtpu: 0.0.40
codegen_flags: <defaults>
</compile_context>

<pallas_src>
import functools

import jax
import jax.numpy as jnp
from jax.experimental import pallas as pl
from jax.experimental.pallas import tpu as pltpu


def _cdiv(a, b):
    return -(-a // b)


def _gram_kernel(x_ref, out_ref, *, batch, batch_tile, tiles_per_split,
                 needs_mask):
    """Accumulate X^T X for one batch tile into this split's output block.

    x_ref:   [batch_tile, f_blk] input window (only ~low_dim lanes streamed).
    out_ref: [f_blk, f_blk] f32 partial Gram for this split (resident across
             the inner "arbitrary" axis; written back to HBM once per split).
    """
    c = pl.program_id(0)   # split (parallel; maps to a TensorCore on v7x)
    k = pl.program_id(1)   # batch tile within the split (arbitrary/reduction)

    @pl.when(k == 0)
    def _init():
        out_ref[...] = jnp.zeros_like(out_ref)

    x = x_ref[...]
    if needs_mask:
        # Zero rows past the true batch (ragged last tile and clamped
        # duplicate tiles).  jnp.where selects, so unspecified out-of-bounds
        # data (even NaN/Inf) never reaches the accumulator.
        tile = c * tiles_per_split + k
        valid = batch - tile * batch_tile
        row_ids = jax.lax.broadcasted_iota(jnp.int32, x.shape, 0)
        x = jnp.where(row_ids < valid, x, jnp.zeros_like(x))

    # Gram accumulation: contract over the batch axis -> [f_blk, f_blk] f32.
    # (transposed-LHS form maps straight onto the MXU; no per-tile vxpose.)
    out_ref[...] += jax.lax.dot_general(
        x, x,
        dimension_numbers=(((0,), (0,)), ((), ())),
        preferred_element_type=jnp.float32,
    )


def _finalize_kernel(gram_ref, out_ref, *, low_dim, inv_tau2, eps2):
    """O(f_blk^2) epilogue: normalize the Gram and reduce to the CE loss.

    gram_ref: [num_splits, f_blk, f_blk] f32 partial Grams (whole array in VMEM).
    out_ref:  [1, 1] f32 scalar loss (SMEM).
    """
    gram = jnp.sum(gram_ref[...], axis=0)                       # [F, F]
    f = gram.shape[0]
    rows = jax.lax.broadcasted_iota(jnp.int32, (f, f), 0)
    cols = jax.lax.broadcasted_iota(jnp.int32, (f, f), 1)

    # Per-column squared norms straight off the Gram diagonal (MXU already
    # computed them) as a [1, F] lane vector.
    d = jnp.sum(jnp.where(rows == cols, gram, 0.0), axis=0, keepdims=True)

    # 1/tau2 folded into the normalization factor: no separate [F, F] pass.
    # eps2 = (1e-12)^2 matches an F.normalize-style clamp on the norm.
    rsd = jax.lax.rsqrt(jnp.maximum(d, eps2)) * (inv_tau2 ** 0.5)   # [1, F]

    # Rank-1 outer product rsd_i * rsd_j via an MXU K==1 contraction.
    scale = jax.lax.dot_general(
        rsd, rsd,
        dimension_numbers=(((0,), (0,)), ((), ())),
        preferred_element_type=jnp.float32,
    )                                                           # [F, F]
    g = gram * scale                                            # == Vt Vt^T / tau2

    # Row max of g over valid columns is its diagonal == 1/tau2 (cosine
    # similarity <= 1), so use the constant shift (no XLU row-max reduce).
    m = jnp.float32(inv_tau2)
    p = jnp.where(cols < low_dim, jnp.exp(g - m), 0.0)          # mask padded cols
    row_sum = jnp.sum(p, axis=1, keepdims=True)                 # [F, 1]
    row_valid = jax.lax.broadcasted_iota(jnp.int32, (f, 1), 0) < low_dim
    sum_lse = jnp.sum(jnp.where(row_valid, jnp.log(row_sum), 0.0)) + m * low_dim

    # diag(G) = d * rsd^2 (already includes 1/tau2); length-F vector op.
    col_valid = jax.lax.broadcasted_iota(jnp.int32, (1, f), 1) < low_dim
    sum_diag = jnp.sum(jnp.where(col_valid, d * rsd * rsd, 0.0))

    out_ref[0, 0] = (sum_lse - sum_diag) / jnp.float32(low_dim)


def feature_decorrelation(features, low_dim, tau2, *, batch_tile=None,
                          num_splits=None):
    """features: [batch, feature_dim] array (f32 or bf16). Returns f32 loss."""
    batch, feature_dim = features.shape
    low_dim = min(int(low_dim), feature_dim)
    inv_tau2 = 1.0 / float(tau2)
    eps2 = 1e-24

    itemsize = jnp.dtype(features.dtype).itemsize

    # Feature window: only round_up(low_dim, 128) lanes are streamed from HBM
    # (or the whole feature_dim when it is already <= that).
    l_pad = _cdiv(low_dim, 128) * 128
    f_blk = feature_dim if feature_dim <= l_pad else l_pad

    # Generation-aware VMEM budgeting (v5e/v6e: 128 MiB, v7x: 64 MiB).
    try:
        vmem_cap = int(pltpu.get_tpu_info().vmem_capacity_bytes)
    except Exception:
        vmem_cap = 64 * 1024 * 1024
    big_vmem = vmem_cap >= 96 * 1024 * 1024
    tile_budget = (16 if big_vmem else 8) * 1024 * 1024     # per input buffer

    row_bytes = max(f_blk * itemsize, 1)
    rows_fit = max(8, tile_budget // row_bytes)
    if rows_fit >= 256:
        rows_fit = (rows_fit // 256) * 256                   # MXU-friendly rows
    else:
        rows_fit = max(8, (rows_fit // 8) * 8)

    if batch_tile is None:
        batch_tile = batch if batch <= rows_fit else rows_fit
    batch_tile = int(batch_tile)
    if batch_tile >= batch:
        batch_tile = batch
    else:
        batch_tile = max(8, (batch_tile // 8) * 8)

    total_tiles = _cdiv(batch, batch_tile)

    if num_splits is None:
        # Heuristic: 64 MiB-VMEM chips (v7x) have two TensorCores -> split the
        # batch across a leading "parallel" axis.  On 1-TC chips a split is
        # just a sequential loop, so keep it at 1 there.
        num_splits = 2 if (not big_vmem and total_tiles >= 2) else 1
    num_splits = max(1, min(int(num_splits), total_tiles))

    tiles_per_split = _cdiv(total_tiles, num_splits)
    # Mask in-kernel iff the logical grid overruns the true batch (ragged last
    # tile and/or duplicate clamped tiles); zero rows contribute nothing.
    needs_mask = (num_splits * tiles_per_split * batch_tile) != batch

    def x_index_map(c, k):
        # Clamp so the block start is always in bounds; duplicate (clamped)
        # tiles are fully masked to zero inside the kernel.
        return (jnp.minimum(c * tiles_per_split + k, total_tiles - 1), 0)

    gram_kernel = functools.partial(
        _gram_kernel,
        batch=batch, batch_tile=batch_tile,
        tiles_per_split=tiles_per_split, needs_mask=needs_mask)

    tile_bytes = batch_tile * f_blk * itemsize
    gram_bytes = f_blk * f_blk * 4
    vmem_limit = 2 * tile_bytes + 2 * gram_bytes + (8 << 20)
    vmem_limit = int(min(max(vmem_limit, 16 << 20), int(vmem_cap * 0.75)))

    partial_grams = pl.pallas_call(
        gram_kernel,
        out_shape=jax.ShapeDtypeStruct((num_splits, f_blk, f_blk), jnp.float32),
        grid_spec=pltpu.PrefetchScalarGridSpec(
            num_scalar_prefetch=0,
            grid=(num_splits, tiles_per_split),
            in_specs=[pl.BlockSpec((batch_tile, f_blk), x_index_map)],
            out_specs=pl.BlockSpec((None, f_blk, f_blk), lambda c, k: (c, 0, 0)),
        ),
        compiler_params=pltpu.CompilerParams(
            dimension_semantics=("parallel", "arbitrary"),
            vmem_limit_bytes=vmem_limit,
        ),
    )(features)

    fin_kernel = functools.partial(
        _finalize_kernel, low_dim=low_dim, inv_tau2=inv_tau2, eps2=eps2)

    loss = pl.pallas_call(
        fin_kernel,
        out_shape=jax.ShapeDtypeStruct((1, 1), jnp.float32),
        grid_spec=pltpu.PrefetchScalarGridSpec(
            num_scalar_prefetch=0,
            grid=(1,),
            in_specs=[pl.BlockSpec((num_splits, f_blk, f_blk),
                                   lambda i: (0, 0, 0))],
            out_specs=pl.BlockSpec(memory_space=pltpu.MemorySpace.SMEM),
        ),
        compiler_params=pltpu.CompilerParams(
            dimension_semantics=("arbitrary",),
        ),
    )(partial_grams)
    return loss[0, 0]


def _reference(features, low_dim, tau2):
    Vt = jnp.transpose(features[:, :low_dim]).astype(jnp.float32)
    norm = jnp.maximum(jnp.linalg.norm(Vt, axis=1, keepdims=True), 1e-12)
    Vt = Vt / norm
    G = jnp.matmul(Vt, Vt.T, precision=jax.lax.Precision.HIGHEST) / tau2
    lse = jax.scipy.special.logsumexp(G, axis=1)
    return jnp.mean(lse - jnp.diagonal(G))


if __name__ == "__main__":
    key = jax.random.PRNGKey(0)
    k1, k2, k3 = jax.random.split(key, 3)

    # Case 1: single tile; feature window == full feature_dim (64 < 128 lanes).
    f1 = jax.random.normal(k1, (16, 64), dtype=jnp.float32)
    l1 = jax.block_until_ready(feature_decorrelation(f1, 32, 2.0))
    r1 = _reference(f1, 32, 2.0)
    assert jnp.allclose(l1, r1, rtol=1e-4, atol=1e-4), (l1, r1)

    # Case 2: ragged batch + forced 2-way split (exercises the clamped
    # duplicate tile and in-kernel row masking -- no HBM pad pass).
    f2 = jax.random.normal(k2, (100, 64), dtype=jnp.float32)
    l2 = jax.block_until_ready(
        feature_decorrelation(f2, 32, 2.0, batch_tile=48, num_splits=2))
    r2 = _reference(f2, 32, 2.0)
    assert jnp.allclose(l2, r2, rtol=1e-4, atol=1e-4), (l2, r2)

    # Case 3: feature-axis windowing -- only 128 of 512 columns are streamed.
    f3 = jax.random.normal(k3, (64, 512), dtype=jnp.float32)
    l3 = jax.block_until_ready(feature_decorrelation(f3, 128, 2.0))
    r3 = _reference(f3, 128, 2.0)
    assert jnp.allclose(l3, r3, rtol=1e-4, atol=1e-4), (l3, r3)

    print("KERNEL_OK")
</pallas_src>

<mosaic_0001>
module attributes {stable_mosaic.version = 11 : i64} {
  func.func @_gram_kernel(%arg0: i32, %arg1: i32, %arg2: memref<16x64xf32, #tpu.memory_space<vmem>>, %arg3: memref<1x64x64xf32, #tpu.memory_space<vmem>>) attributes {dimension_semantics = [#tpu.dimension_semantics<parallel>, #tpu.dimension_semantics<arbitrary>], iteration_bounds = array<i64: 1, 1>, scalar_prefetch = 0 : i64, scratch_operands = 0 : i64, tpu.core_type = #tpu.core_type<tc>, window_params = [{transform_indices = @transform_0, window_bounds = array<i64: 16, 64>}, {transform_indices = @transform_1, window_bounds = array<i64: 1, 64, 64>}]} {
    %c0_i32 = arith.constant 0 : i32
    %0 = arith.cmpi eq, %arg1, %c0_i32 : i32
    %1 = arith.extui %0 : i1 to i32
    %c0_i32_0 = arith.constant 0 : i32
    %2 = arith.cmpi ne, %1, %c0_i32_0 : i32
    scf.if %2 {
      %cst_8 = arith.constant 0.000000e+00 : f32
      %11 = vector.broadcast %cst_8 : f32 to vector<64x64xf32>
      %c0_9 = arith.constant 0 : index
      %c0_10 = arith.constant 0 : index
      %c0_11 = arith.constant 0 : index
      %12 = vector.load %arg3[%c0_9, %c0_10, %c0_11] : memref<1x64x64xf32, #tpu.memory_space<vmem>>, vector<1x64x64xf32>
      %13 = vector.shape_cast %12 : vector<1x64x64xf32> to vector<64x64xf32>
      %14 = vector.shape_cast %11 : vector<64x64xf32> to vector<1x64x64xf32>
      tpu.vector_store %arg3[%c0_9, %c0_10, %c0_11], %14 {strides = array<i32>} : memref<1x64x64xf32, #tpu.memory_space<vmem>>, vector<1x64x64xf32>,
    } else {
    }
    %c0 = arith.constant 0 : index
    %c0_1 = arith.constant 0 : index
    %3 = vector.load %arg2[%c0, %c0_1] : memref<16x64xf32, #tpu.memory_space<vmem>>, vector<16x64xf32>
    %c0_2 = arith.constant 0 : index
    %c0_3 = arith.constant 0 : index
    %c0_4 = arith.constant 0 : index
    %4 = vector.load %arg3[%c0_2, %c0_3, %c0_4] : memref<1x64x64xf32, #tpu.memory_space<vmem>>, vector<1x64x64xf32>
    %5 = vector.shape_cast %4 : vector<1x64x64xf32> to vector<64x64xf32>
    %cst = arith.constant dense<0.000000e+00> : vector<64x64xf32>
    %6 = tpu.matmul %3, %3, %cst {dimension_numbers = #tpu.dot_dimension_numbers<[0], [0], [1], [1], [0, 1, 1, 1], [], []>} : vector<16x64xf32>, vector<16x64xf32>, vector<64x64xf32> -> vector<64x64xf32>
    %7 = arith.addf %5, %6 : vector<64x64xf32>
    %c0_5 = arith.constant 0 : index
    %c0_6 = arith.constant 0 : index
    %c0_7 = arith.constant 0 : index
    %8 = vector.load %arg3[%c0_5, %c0_6, %c0_7] : memref<1x64x64xf32, #tpu.memory_space<vmem>>, vector<1x64x64xf32>
    %9 = vector.shape_cast %8 : vector<1x64x64xf32> to vector<64x64xf32>
    %10 = vector.shape_cast %7 : vector<64x64xf32> to vector<1x64x64xf32>
    tpu.vector_store %arg3[%c0_5, %c0_6, %c0_7], %10 {strides = array<i32>} : memref<1x64x64xf32, #tpu.memory_space<vmem>>, vector<1x64x64xf32>,
    return
  }
  func.func @transform_0(%arg0: i32, %arg1: i32) -> (i32, i32) {
    %c1_i32 = arith.constant 1 : i32
    %0 = arith.muli %arg0, %c1_i32 : i32
    %1 = arith.addi %0, %arg1 : i32
    %c0_i32 = arith.constant 0 : i32
    %2 = arith.minsi %1, %c0_i32 : i32
    %c0_i32_0 = arith.constant 0 : i32
    %c0_i32_1 = arith.constant 0 : i32
    return %2, %c0_i32_0 : i32, i32
  }
  func.func @transform_1(%arg0: i32, %arg1: i32) -> (i32, i32, i32) {
    %c0_i32 = arith.constant 0 : i32
    %c0_i32_0 = arith.constant 0 : i32
    %c0_i32_1 = arith.constant 0 : i32
    return %arg0, %c0_i32, %c0_i32_0 : i32, i32, i32
  }
}

</mosaic_0001>

<bundles_post_ra>
// kernel: tpu_custom_call.1
= control target key start
LH: loop header
LB: loop body
LE: loop exit
PB: predicated region body
PF: predicated region fallthrough
CT: control target
= control target key end

     0   :  { %6 = vsyncpa [#allocation3], 0  ;;  %s316_s0 = inlined_call_operand.hbm [shape: f32[16,64], index: 0, kind: input, shape index: {}]   ;;  %s317_s1 = inlined_call_operand.hbm [shape: f32[1,64,64], index: 1, kind: output, shape index: {}]  }
   0x1   :  { %7 = vsyncpa [#allocation4], 0  ;;  %s18_s8 = sshll.u32 %s316_s0, 4  ;;  %s265_s9 = smov [#allocation2]   ;;  %s19_s8 = int_to_ptr.hbm [resolvable:$true] %s18_s8 }
   0x2   :  { %s20_s10 = sshll.u32 %s265_s9, 4  ;;  %s266_s11 = smov 128   ;;  %s21_s10 = int_to_ptr.vmem [resolvable:$true] %s20_s10 }
   0x3   :  { %s267_s12 = smov 8  }
   0x4   :  { %26 = dma.hbm_to_vmem [thread:$0]  %s19_s8, 256, %s21_s10, [#allocation3], %s266_s11, %s266_s11, %s267_s12  }
   0x5   :  { %261 = dma.done.wait [#allocation3], 256  }
   0x6   :  { %262 = vsyncadd [#allocation3], 4294967040  ;;  %v48_v0 = vld [vmem:[#allocation2] sm:$0xff]  ;;  %v49_v1 = vld [vmem:[#allocation2 + $0x8] sm:$0xff]  ;;  %vm90_vm0 = vcmask 130048   ;;  %vm39_vm1 = vcmask 523264  }
   0x7   :  { %58 = vxpose.xlu0.b32.start [1/2] (short) (narrow) %v48_v0, 64  ;;  %129 = vmatpush.msra.mxu0 %v49_v1  ;;  %v268_v6 = vmov 0.0   ;;  %s269_s0 = smov [#allocation5]   ;;  %s179_s16 = sshll.u32 %s317_s1, 4  ;;  %s180_s16 = int_to_ptr.hbm [resolvable:$true] %s179_s16 }
   0x8   :  { %202 = vmatpush.msra.mxu1 %v49_v1  ;;  %203 = vmatpush.msra.mxu2 %v49_v1  ;;  %40 = vst.msk [vmem:[#allocation5] sm:$0xff] %vm39_vm1, %v268_v6  ;;  %s177_s13 = sshll.u32 %s269_s0, 4  ;;  %s178_s13 = int_to_ptr.vmem [resolvable:$true] %s177_s13 }
   0x9   :  { %130 = vmatpush.msra.mxu0 %v48_v0  ;;  %204 = vmatpush.msra.mxu3 %v49_v1  ;;  %41 = vst.msk [vmem:[#allocation5 + $0x8] sm:$0xff] %vm39_vm1, %v268_v6 }
   0xa   :  { %205 = vmatpush.msra.mxu1 %v48_v0  ;;  %206 = vmatpush.msra.mxu2 %v48_v0  ;;  %42 = vst.msk [vmem:[#allocation5 + $0x10] sm:$0xff] %vm39_vm1, %v268_v6 }
   0xb   :  { %207 = vmatpush.msra.mxu3 %v48_v0  ;;  %43 = vst.msk [vmem:[#allocation5 + $0x18] sm:$0xff] %vm39_vm1, %v268_v6 }
   0xc   :  { %44 = vst.msk [vmem:[#allocation5 + $0x20] sm:$0xff] %vm39_vm1, %v268_v6 }
   0xd   :  { %45 = vst.msk [vmem:[#allocation5 + $0x28] sm:$0xff] %vm39_vm1, %v268_v6 }
   0xe   :  { %46 = vst.msk [vmem:[#allocation5 + $0x30] sm:$0xff] %vm39_vm1, %v268_v6 }
   0xf   :  { %59 = vxpose.xlu0.b32.end [2/2] (short) (narrow) %v49_v1, 64  ;;  %47 = vst.msk [vmem:[#allocation5 + $0x38] sm:$0xff] %vm39_vm1, %v268_v6  ;;  %v50_v11 = vld [vmem:[#allocation5] sm:$0xff] }
  0x10   :  { %v51_v14 = vld [vmem:[#allocation5 + $0x8] sm:$0xff] }
  0x11   :  { %v52_v17 = vld [vmem:[#allocation5 + $0x10] sm:$0xff] }
  0x12   :  { %v53_v20 = vld [vmem:[#allocation5 + $0x18] sm:$0xff] }
  0x13   :  { %v54_v23 = vld [vmem:[#allocation5 + $0x20] sm:$0xff] }
  0x14   :  { %v55_v26 = vld [vmem:[#allocation5 + $0x28] sm:$0xff] }
  0x15   :  { %v56_v29 = vld [vmem:[#allocation5 + $0x30] sm:$0xff] }
  0x16   :  { %v57_v32 = vld [vmem:[#allocation5 + $0x38] sm:$0xff] }
  0xab   :  { %v74_v2 = vpop.trf.xlu0 }
  0xac   :  { %194 = vmatmul.msk.f32.vlgmr.msra.gmra.mxu0 %vm90_vm0, %v74_v2 }
  0xb3   :  { %v75_v3 = vpop.trf.xlu0 }
  0xb4   :  { %195 = vmatmul.msk.f32.gmra.mxu0 %vm90_vm0, %v75_v3 }
  0xbb   :  { %v76_v4 = vpop.trf.xlu0 }
  0xbc   :  { %196 = vmatmul.msk.f32.vlgmr.msra.gmra.mxu1 %vm90_vm0, %v76_v4 }
  0xc3   :  { %v77_v5 = vpop.trf.xlu0 }
  0xc4   :  { %197 = vmatmul.msk.f32.gmra.mxu1 %vm90_vm0, %v77_v5 }
  0xcb   :  { %v78_v7 = vpop.trf.xlu0 }
  0xcc   :  { %198 = vmatmul.msk.f32.vlgmr.msra.gmra.mxu2 %vm90_vm0, %v78_v7 }
  0xd3   :  { %v79_v8 = vpop.trf.xlu0 }
  0xd4   :  { %199 = vmatmul.msk.f32.gmra.mxu2 %vm90_vm0, %v79_v8 }
  0xdb   :  { %v80_v9 = vpop.trf.xlu0 }
  0xdc   :  { %200 = vmatmul.msk.f32.vlgmr.msra.gmra.mxu3 %vm90_vm0, %v80_v9 }
  0xe3   :  { %v81_v10 = vpop.trf.xlu0 }
  0xe4   :  { %201 = vmatmul.msk.f32.gmra.mxu3 %vm90_vm0, %v81_v10 }
 0x129   :  { %v132_v12 = vpop.f32.mrf.mxu0 }
 0x12a   :  { %v156_v13 = vadd.f32 %v132_v12, %v50_v11 }
 0x12c   :  { %165 = vst.msk [vmem:[#allocation5] sm:$0xff] %vm39_vm1, %v156_v13 }
 0x131   :  { %v135_v15 = vpop.f32.mrf.mxu0 }
 0x132   :  { %v157_v16 = vadd.f32 %v135_v15, %v51_v14 }
 0x134   :  { %166 = vst.msk [vmem:[#allocation5 + $0x8] sm:$0xff] %vm39_vm1, %v157_v16 }
 0x139   :  { %v138_v18 = vpop.f32.mrf.mxu1 }
 0x13a   :  { %v158_v19 = vadd.f32 %v138_v18, %v52_v17 }
 0x13c   :  { %167 = vst.msk [vmem:[#allocation5 + $0x10] sm:$0xff] %vm39_vm1, %v158_v19 }
 0x141   :  { %v141_v21 = vpop.f32.mrf.mxu1 }
 0x142   :  { %v159_v22 = vadd.f32 %v141_v21, %v53_v20 }
 0x144   :  { %168 = vst.msk [vmem:[#allocation5 + $0x18] sm:$0xff] %vm39_vm1, %v159_v22 }
 0x14f   :  { %v144_v24 = vpop.f32.mrf.mxu2 }
 0x150   :  { %v160_v25 = vadd.f32 %v144_v24, %v54_v23 }
 0x152   :  { %169 = vst.msk [vmem:[#allocation5 + $0x20] sm:$0xff] %vm39_vm1, %v160_v25 }
 0x157   :  { %v147_v27 = vpop.f32.mrf.mxu2 }
 0x158   :  { %v161_v28 = vadd.f32 %v147_v27, %v55_v26 }
 0x15a   :  { %170 = vst.msk [vmem:[#allocation5 + $0x28] sm:$0xff] %vm39_vm1, %v161_v28 }
 0x15f   :  { %v150_v30 = vpop.f32.mrf.mxu3 }
 0x160   :  { %v162_v31 = vadd.f32 %v150_v30, %v56_v29 }
 0x162   :  { %171 = vst.msk [vmem:[#allocation5 + $0x30] sm:$0xff] %vm39_vm1, %v162_v31 }
 0x167   :  { %v153_v33 = vpop.f32.mrf.mxu3 }
 0x168   :  { %v163_v34 = vadd.f32 %v153_v33, %v57_v32 }
 0x16a   :  { %172 = vst.msk [vmem:[#allocation5 + $0x38] sm:$0xff] %vm39_vm1, %v163_v34 }
 0x16b   :  { %185 = dma.vmem_to_hbm [thread:$0]  %s178_s13, 1024, %s180_s16, [#allocation4], %s266_s11, %s266_s11, %s267_s12  }
 0x16c   :  { %263 = dma.done.wait [#allocation4], 1024  }
 0x16d   :  { %264 = vsyncadd [#allocation4], 4294966272 }
 0x16e   :  { %190 = vsyncpa [#allocation3], 1 }
 0x16f   :  { %191 = vsyncpa [#allocation4], 1 }

</bundles_post_ra>
